<compile_context>
chip_gen: v6e
topology: v6e:2x2x1
jax: 0.10.0
libtpu: 0.0.40
codegen_flags: <defaults>
</compile_context>

<pallas_src>
import jax
import jax.numpy as jnp
from jax.experimental import pallas as pl
from jax.experimental.pallas import tpu as pltpu


def _round_up(x, m):
    return (x + m - 1) // m * m


def _cdiv(a, b):
    return (a + b - 1) // b


# ----------------------------------------------------------------------------
# Pallas kernel.
#   grid = (n_dims, nk); d selects the cochain dim ("parallel"), k walks cell
#   tiles ("arbitrary" reduction axis, innermost).
#   Scalar prefetch (SMEM): nk_d = #tiles actually occupied by dim d,
#                           off_d = row-block offset of dim d in the concat.
#   For each dim d:
#       pooled_d = sum_{k < nk_d} onehot(batch_tile_k) @ x_tile_k   (f32 acc)
#       h_d      = relu(pooled_d @ W1_d + b1_d)
#       out[d]   = h_d @ W2_d     (per-dim lin2 block; summed + b2 outside)
# ----------------------------------------------------------------------------
def _tgaa_head_kernel(nk_ref, off_ref, batch_ref, x_ref, w1_ref, b1_ref,
                      w2_ref, out_ref, pooled_ref):
    d = pl.program_id(0)
    k = pl.program_id(1)
    last_k = pl.num_programs(1) - 1

    @pl.when(k == 0)
    def _():
        pooled_ref[...] = jnp.zeros_like(pooled_ref)
        out_ref[...] = jnp.zeros_like(out_ref)      # cheap insurance

    # Segment-sum pooling of this cell tile as an on-chip one-hot matmul built
    # from the int32 batch ids (pad ids == -1 match no graph).  Tiles past this
    # dim's real extent are skipped; their DMA is also elided because the
    # index_map clamps to a repeated block index.
    @pl.when(k < nk_ref[d])
    def _():
        b_pad = pooled_ref.shape[0]
        tile_n = x_ref.shape[0]
        graph_ids = jax.lax.broadcasted_iota(jnp.int32, (b_pad, tile_n), 0)
        onehot = (batch_ref[...] == graph_ids).astype(x_ref.dtype)
        pooled_ref[...] += jnp.dot(onehot, x_ref[...],
                                   preferred_element_type=jnp.float32)

    # Last tile of this dim: lin1 + ReLU + per-dim lin2 block.
    @pl.when(k == last_k)
    def _():
        h = jnp.dot(pooled_ref[...].astype(w1_ref.dtype), w1_ref[0],
                    preferred_element_type=jnp.float32) + b1_ref[0]
        h = jnp.maximum(h, 0.0)                # ReLU kept in f32 (v5e-friendly)
        out_ref[0] = jnp.dot(h.astype(w2_ref.dtype), w2_ref[0],
                             preferred_element_type=jnp.float32)


def tgaa_head(xs, batches, batch_size, w1s, b1s, w2s, b2, *, tile_n=8192,
              x_stream_vmem_budget=24 * 1024 * 1024):
    """xs: list of [N_d, H] (any float dtype); batches: list of int32 [N_d];
       w1s: list of [H, 2H]; b1s: list of [1, 2H]; w2s: list of [2H, out];
       b2: [1, out]."""
    n_dims = len(xs)
    hidden = xs[0].shape[1]
    fh = w1s[0].shape[1]
    out_size = b2.shape[-1]

    # Lane/sublane-dense padded sizes (weights / outputs only; x keeps native H).
    fh_pad = _round_up(fh, 128)
    out_pad = _round_up(out_size, 128)
    b_pad = _round_up(max(batch_size, 8), 8)

    # ---- generation-agnostic tile sizing ------------------------------------
    # Per cell row the kernel holds: bf16 x (double-buffered), int32 batch ids
    # (double-buffered) and the on-chip iota / one-hot temporaries.
    n_max = max(x.shape[0] for x in xs)
    bytes_per_row = 2 * (2 * hidden) + 2 * 4 + 8 * b_pad
    max_tile = max(128, (x_stream_vmem_budget // bytes_per_row) // 128 * 128)
    tile_n = min(_round_up(max(tile_n, 128), 128), max_tile,
                 _round_up(n_max, 128))

    # ---- host-side prep: bf16 features, pad only N, per-dim concat ---------
    x_parts, b_parts, nk_per_dim, off_per_dim = [], [], [], []
    off = 0
    for x, b in zip(xs, batches):
        n_d = x.shape[0]
        nk_d = max(1, _cdiv(n_d, tile_n))
        pad_rows = nk_d * tile_n - n_d
        x_parts.append(jnp.pad(x.astype(jnp.bfloat16),
                               ((0, pad_rows), (0, 0))))
        b_parts.append(jnp.pad(b.astype(jnp.int32), (0, pad_rows),
                               constant_values=-1))
        nk_per_dim.append(nk_d)
        off_per_dim.append(off)
        off += nk_d
    x_cat = jnp.concatenate(x_parts, axis=0)          # [sum_d nk_d*tile_n, H]
    batch_cat = jnp.concatenate(b_parts)[None, :]     # [1, sum_d nk_d*tile_n]
    nk = max(nk_per_dim)
    nk_arr = jnp.asarray(nk_per_dim, jnp.int32)
    off_arr = jnp.asarray(off_per_dim, jnp.int32)

    # Weights: per-dim stacks, zero-padded only on the small fh / out lanes.
    w1_stack = jnp.stack([jnp.pad(w.astype(jnp.bfloat16),
                                  ((0, 0), (0, fh_pad - fh))) for w in w1s])
    b1_stack = jnp.stack([jnp.pad(jnp.reshape(b, (1, -1)).astype(jnp.float32),
                                  ((0, 0), (0, fh_pad - fh))) for b in b1s])
    w2_stack = jnp.stack([jnp.pad(w.astype(jnp.bfloat16),
                                  ((0, fh_pad - fh), (0, out_pad - out_size)))
                          for w in w2s])

    # ---- specs (index_maps get the scalar-prefetch refs positionally) ------
    def x_map(d, k, nk_ref, off_ref):
        return (off_ref[d] + jnp.minimum(k, nk_ref[d] - 1), 0)

    def batch_map(d, k, nk_ref, off_ref):
        return (0, off_ref[d] + jnp.minimum(k, nk_ref[d] - 1))

    def dim_map(d, k, nk_ref, off_ref):
        return (d, 0, 0)

    vmem_needed = (2 * tile_n * hidden * 2           # x double buffer (bf16)
                   + 2 * tile_n * 4                  # batch ids double buffer
                   + 8 * b_pad * tile_n              # iota / one-hot temps
                   + 2 * hidden * fh_pad * 2         # W1
                   + 2 * fh_pad * 4                  # b1
                   + 2 * fh_pad * out_pad * 2        # W2
                   + 2 * b_pad * out_pad * 4         # out block
                   + b_pad * (hidden + fh_pad) * 4)  # pooled scratch + h
    vmem_limit = int(min(56 * 1024 * 1024,
                         max(32 * 1024 * 1024, vmem_needed * 3 // 2)))

    total_rows = x_cat.shape[0]
    flops = (2 * total_rows * b_pad * hidden
             + 2 * n_dims * b_pad * (hidden * fh_pad + fh_pad * out_pad))
    bytes_accessed = int(x_cat.size * 2 + batch_cat.size * 4
                         + w1_stack.size * 2 + b1_stack.size * 4
                         + w2_stack.size * 2 + n_dims * b_pad * out_pad * 4)

    partials = pl.pallas_call(
        _tgaa_head_kernel,
        out_shape=jax.ShapeDtypeStruct((n_dims, b_pad, out_pad), jnp.float32),
        grid_spec=pltpu.PrefetchScalarGridSpec(
            num_scalar_prefetch=2,
            grid=(n_dims, nk),
            in_specs=[
                pl.BlockSpec((1, tile_n), batch_map),         # batch ids
                pl.BlockSpec((tile_n, hidden), x_map),        # x tile (native H)
                pl.BlockSpec((1, hidden, fh_pad), dim_map),   # W1_d
                pl.BlockSpec((1, 1, fh_pad), dim_map),        # b1_d
                pl.BlockSpec((1, fh_pad, out_pad), dim_map),  # W2_d
            ],
            out_specs=pl.BlockSpec((1, b_pad, out_pad), dim_map),
            scratch_shapes=[pltpu.VMEM((b_pad, hidden), jnp.float32)],
        ),
        compiler_params=pltpu.CompilerParams(
            dimension_semantics=("parallel", "arbitrary"),
            vmem_limit_bytes=vmem_limit),
        cost_estimate=pl.CostEstimate(flops=flops, transcendentals=0,
                                      bytes_accessed=bytes_accessed),
    )(nk_arr, off_arr, batch_cat, x_cat, w1_stack, b1_stack, w2_stack)

    # Sum per-dim lin2 partials (== lin2(cat(h_0..h_D))), add bias, unpad.
    out = partials.sum(axis=0)[:batch_size, :out_size] + b2
    return out


# ----------------------------------------------------------------------------
# Plain-JAX glue: embeddings, boundary reduce, parameter init.
# ----------------------------------------------------------------------------
def tgaa_forward(node_types, edge_types, cell_boundaries,
                 batches, batch_size, params):
    """Forward pass of TGAA (conv stack elided, see TODOs)."""
    # init_conv (emb_method='embed'); bf16 embedding tables so the gathers
    # already produce the kernel's streaming dtype (no extra cast/copy pass).
    x0 = jnp.take(params["atom_emb"], node_types, axis=0)        # [N0, H]
    x1 = jnp.take(params["bond_emb"], edge_types, axis=0)        # [N1, H]
    # InitReduceConv(reduce='sum'): 2-cell feature = sum of its boundary edges.
    x2 = jnp.take(x1, cell_boundaries, axis=0).sum(axis=1)       # [N2, H]
    xs = [x0, x1, x2]

    # TODO(synk): SparseCINConv layers (message passing) are not defined in the
    # reference code; skipped here (identity), so jump_mode=None yields the
    # initial embeddings.
    # TODO(synk): create_ro_weight / ro_weights are not defined in the
    # reference; implemented as per-graph sum-pool readout inside the kernel.

    return tgaa_head(xs, batches, batch_size,
                     params["w1s"], params["b1s"], params["w2s"], params["b2"])


def _glorot(key, shape):
    fan_in, fan_out = shape[0], shape[-1]
    scale = jnp.sqrt(6.0 / (fan_in + fan_out))
    return jax.random.uniform(key, shape, jnp.float32, -scale, scale)


def init_params(key, atom_types, bond_types, hidden, out_size,
                final_hidden_multiplier=2, max_dim=2):
    fh = final_hidden_multiplier * hidden
    keys = jax.random.split(key, 2 + 2 * (max_dim + 1))
    params = {
        # bf16 tables -> gathered features are already in the streaming dtype.
        "atom_emb": (jax.random.normal(keys[0], (atom_types, hidden),
                                       jnp.float32) * 0.1).astype(jnp.bfloat16),
        "bond_emb": (jax.random.normal(keys[1], (bond_types, hidden),
                                       jnp.float32) * 0.1).astype(jnp.bfloat16),
        "w1s": [], "b1s": [], "w2s": [],
        "b2": jnp.zeros((1, out_size), jnp.float32),
    }
    k = 2
    for _ in range(max_dim + 1):
        params["w1s"].append(_glorot(keys[k], (hidden, fh))); k += 1
        params["b1s"].append(jnp.zeros((1, fh), jnp.float32))
        # lin2 weight [(max_dim+1)*fh, out] split into per-dim blocks [fh, out].
        params["w2s"].append(_glorot(keys[k], (fh, out_size))); k += 1
    return params


def _reference_head(xs, batches, batch_size, params):
    """Pure-JAX f32 reference of the readout head (for correctness check)."""
    out = jnp.broadcast_to(params["b2"], (batch_size, params["b2"].shape[-1]))
    for d, (x, b) in enumerate(zip(xs, batches)):
        onehot = (b[None, :] ==
                  jnp.arange(batch_size, dtype=jnp.int32)[:, None]
                  ).astype(jnp.float32)
        pooled = onehot @ x.astype(jnp.float32)
        h = jnp.maximum(pooled @ params["w1s"][d] + params["b1s"][d], 0.0)
        out = out + h @ params["w2s"][d]
    return out


if __name__ == "__main__":
    key = jax.random.PRNGKey(0)

    # Small synthetic cell complex: 16 nodes, 16 edges, 8 two-cells, 2 graphs.
    ATOM_TYPES, BOND_TYPES = 10, 5
    HIDDEN, OUT_SIZE = 32, 8
    N0, N1, N2, B = 16, 16, 8, 2

    k_nt, k_et, k_cb, k_p = jax.random.split(key, 4)
    node_types = jax.random.randint(k_nt, (N0,), 0, ATOM_TYPES, jnp.int32)
    edge_types = jax.random.randint(k_et, (N1,), 0, BOND_TYPES, jnp.int32)
    # Each 2-cell has 3 boundary edges (indices into edges).
    cell_boundaries = jax.random.randint(k_cb, (N2, 3), 0, N1, jnp.int32)

    # Per-cell graph assignment (first half -> graph 0, second half -> graph 1).
    batch0 = jnp.repeat(jnp.arange(B, dtype=jnp.int32), N0 // B)
    batch1 = jnp.repeat(jnp.arange(B, dtype=jnp.int32), N1 // B)
    batch2 = jnp.repeat(jnp.arange(B, dtype=jnp.int32), N2 // B)
    batches = [batch0, batch1, batch2]

    params = init_params(k_p, ATOM_TYPES, BOND_TYPES, HIDDEN, OUT_SIZE)

    out = tgaa_forward(node_types, edge_types, cell_boundaries,
                       batches, B, params)
    out = jax.block_until_ready(out)
    assert out.shape == (B, OUT_SIZE)

    # Cross-check against a pure-JAX f32 reference (bf16 operands -> loose tol).
    x0 = jnp.take(params["atom_emb"], node_types, axis=0)
    x1 = jnp.take(params["bond_emb"], edge_types, axis=0)
    x2 = jnp.take(x1, cell_boundaries, axis=0).sum(axis=1)
    ref = _reference_head([x0, x1, x2], batches, B, params)
    assert jnp.allclose(out, ref, rtol=1e-1, atol=5e-2), "mismatch vs reference"

    print("KERNEL_OK")
</pallas_src>

<mosaic_0001>
module attributes {stable_mosaic.version = 11 : i64} {
  func.func @_tgaa_head_kernel(%arg0: i32, %arg1: i32, %arg2: memref<3xi32, #tpu.memory_space<smem>>, %arg3: memref<3xi32, #tpu.memory_space<smem>>, %arg4: memref<1x128xi32, #tpu.memory_space<vmem>>, %arg5: memref<128x32xbf16, #tpu.memory_space<vmem>>, %arg6: memref<1x32x128xbf16, #tpu.memory_space<vmem>>, %arg7: memref<1x1x128xf32, #tpu.memory_space<vmem>>, %arg8: memref<1x128x128xbf16, #tpu.memory_space<vmem>>, %arg9: memref<1x8x128xf32, #tpu.memory_space<vmem>>, %arg10: memref<8x32xf32, #tpu.memory_space<vmem>>) attributes {dimension_semantics = [#tpu.dimension_semantics<parallel>, #tpu.dimension_semantics<arbitrary>], iteration_bounds = array<i64: 3, 1>, scalar_prefetch = 2 : i64, scratch_operands = 1 : i64, tpu.core_type = #tpu.core_type<tc>, window_params = [{transform_indices = @transform_0, window_bounds = array<i64: 1, 128>}, {transform_indices = @transform_1, window_bounds = array<i64: 128, 32>}, {transform_indices = @transform_2, window_bounds = array<i64: 1, 32, 128>}, {transform_indices = @transform_3, window_bounds = array<i64: 1, 1, 128>}, {transform_indices = @transform_4, window_bounds = array<i64: 1, 128, 128>}, {transform_indices = @transform_5, window_bounds = array<i64: 1, 8, 128>}]} {
    %c0_i32 = arith.constant 0 : i32
    %0 = arith.cmpi eq, %arg1, %c0_i32 : i32
    %1 = arith.extui %0 : i1 to i32
    %c0_i32_0 = arith.constant 0 : i32
    %2 = arith.cmpi ne, %1, %c0_i32_0 : i32
    scf.if %2 {
      %cst = arith.constant 0.000000e+00 : f32
      %11 = vector.broadcast %cst : f32 to vector<8x32xf32>
      %c0 = arith.constant 0 : index
      %c0_4 = arith.constant 0 : index
      %12 = vector.load %arg10[%c0, %c0_4] : memref<8x32xf32, #tpu.memory_space<vmem>>, vector<8x32xf32>
      tpu.vector_store %arg10[%c0, %c0_4], %11 {strides = array<i32>} : memref<8x32xf32, #tpu.memory_space<vmem>>, vector<8x32xf32>,
      %cst_5 = arith.constant 0.000000e+00 : f32
      %13 = vector.broadcast %cst_5 : f32 to vector<1x8x128xf32>
      %c0_6 = arith.constant 0 : index
      %c0_7 = arith.constant 0 : index
      %c0_8 = arith.constant 0 : index
      %14 = vector.load %arg9[%c0_6, %c0_7, %c0_8] : memref<1x8x128xf32, #tpu.memory_space<vmem>>, vector<1x8x128xf32>
      tpu.vector_store %arg9[%c0_6, %c0_7, %c0_8], %13 {strides = array<i32>} : memref<1x8x128xf32, #tpu.memory_space<vmem>>, vector<1x8x128xf32>,
    } else {
    }
    %3 = arith.index_cast %arg0 : i32 to index
    %4 = memref.load %arg2[%3] : memref<3xi32, #tpu.memory_space<smem>>
    %5 = arith.cmpi slt, %arg1, %4 : i32
    %6 = arith.extui %5 : i1 to i32
    %c0_i32_1 = arith.constant 0 : i32
    %7 = arith.cmpi ne, %6, %c0_i32_1 : i32
    scf.if %7 {
      %11 = tpu.iota {dimensions = array<i32: 0>} : vector<8x128xi32>
      %c0 = arith.constant 0 : index
      %c0_4 = arith.constant 0 : index
      %12 = vector.load %arg4[%c0, %c0_4] : memref<1x128xi32, #tpu.memory_space<vmem>>, vector<1x128xi32>
      %13 = vector.broadcast %12 : vector<1x128xi32> to vector<8x128xi32>
      %14 = arith.cmpi eq, %13, %11 : vector<8x128xi32>
      %15 = arith.extui %14 : vector<8x128xi1> to vector<8x128xi32>
      %16 = arith.sitofp %15 : vector<8x128xi32> to vector<8x128xf32>
      %17 = arith.truncf %16 : vector<8x128xf32> to vector<8x128xbf16>
      %c0_5 = arith.constant 0 : index
      %c0_6 = arith.constant 0 : index
      %18 = vector.load %arg10[%c0_5, %c0_6] : memref<8x32xf32, #tpu.memory_space<vmem>>, vector<8x32xf32>
      %c0_7 = arith.constant 0 : index
      %c0_8 = arith.constant 0 : index
      %19 = vector.load %arg5[%c0_7, %c0_8] : memref<128x32xbf16, #tpu.memory_space<vmem>>, vector<128x32xbf16>
      %cst = arith.constant dense<0.000000e+00> : vector<8x32xf32>
      %20 = tpu.matmul %17, %19, %cst {dimension_numbers = #tpu.dot_dimension_numbers<[1], [0], [0], [1], [0, 0, 1, 1], [], []>} : vector<8x128xbf16>, vector<128x32xbf16>, vector<8x32xf32> -> vector<8x32xf32>
      %21 = arith.addf %18, %20 : vector<8x32xf32>
      %c0_9 = arith.constant 0 : index
      %c0_10 = arith.constant 0 : index
      %22 = vector.load %arg10[%c0_9, %c0_10] : memref<8x32xf32, #tpu.memory_space<vmem>>, vector<8x32xf32>
      tpu.vector_store %arg10[%c0_9, %c0_10], %21 {strides = array<i32>} : memref<8x32xf32, #tpu.memory_space<vmem>>, vector<8x32xf32>,
    } else {
    }
    %c0_i32_2 = arith.constant 0 : i32
    %8 = arith.cmpi eq, %arg1, %c0_i32_2 : i32
    %9 = arith.extui %8 : i1 to i32
    %c0_i32_3 = arith.constant 0 : i32
    %10 = arith.cmpi ne, %9, %c0_i32_3 : i32
    scf.if %10 {
      %c0 = arith.constant 0 : index
      %c0_4 = arith.constant 0 : index
      %11 = vector.load %arg10[%c0, %c0_4] : memref<8x32xf32, #tpu.memory_space<vmem>>, vector<8x32xf32>
      %12 = arith.truncf %11 : vector<8x32xf32> to vector<8x32xbf16>
      %c0_5 = arith.constant 0 : index
      %c0_6 = arith.constant 0 : index
      %c0_7 = arith.constant 0 : index
      %13 = vector.load %arg6[%c0_5, %c0_6, %c0_7] : memref<1x32x128xbf16, #tpu.memory_space<vmem>>, vector<1x32x128xbf16>
      %14 = vector.shape_cast %13 : vector<1x32x128xbf16> to vector<32x128xbf16>
      %cst = arith.constant dense<0.000000e+00> : vector<8x128xf32>
      %15 = tpu.matmul %12, %14, %cst {dimension_numbers = #tpu.dot_dimension_numbers<[1], [0], [0], [1], [0, 0, 1, 1], [], []>} : vector<8x32xbf16>, vector<32x128xbf16>, vector<8x128xf32> -> vector<8x128xf32>
      %c0_8 = arith.constant 0 : index
      %c0_9 = arith.constant 0 : index
      %c0_10 = arith.constant 0 : index
      %16 = vector.load %arg7[%c0_8, %c0_9, %c0_10] : memref<1x1x128xf32, #tpu.memory_space<vmem>>, vector<1x1x128xf32>
      %17 = vector.shape_cast %16 : vector<1x1x128xf32> to vector<1x128xf32>
      %18 = vector.broadcast %17 : vector<1x128xf32> to vector<8x128xf32>
      %19 = arith.addf %15, %18 : vector<8x128xf32>
      %cst_11 = arith.constant 0.000000e+00 : f32
      %20 = vector.broadcast %cst_11 : f32 to vector<8x128xf32>
      %21 = arith.maximumf %19, %20 : vector<8x128xf32>
      %22 = arith.truncf %21 : vector<8x128xf32> to vector<8x128xbf16>
      %c0_12 = arith.constant 0 : index
      %c0_13 = arith.constant 0 : index
      %c0_14 = arith.constant 0 : index
      %23 = vector.load %arg8[%c0_12, %c0_13, %c0_14] : memref<1x128x128xbf16, #tpu.memory_space<vmem>>, vector<1x128x128xbf16>
      %24 = vector.shape_cast %23 : vector<1x128x128xbf16> to vector<128x128xbf16>
      %cst_15 = arith.constant dense<0.000000e+00> : vector<8x128xf32>
      %25 = tpu.matmul %22, %24, %cst_15 {dimension_numbers = #tpu.dot_dimension_numbers<[1], [0], [0], [1], [0, 0, 1, 1], [], []>} : vector<8x128xbf16>, vector<128x128xbf16>, vector<8x128xf32> -> vector<8x128xf32>
      %c0_16 = arith.constant 0 : index
      %c0_17 = arith.constant 0 : index
      %c0_18 = arith.constant 0 : index
      %26 = vector.load %arg9[%c0_16, %c0_17, %c0_18] : memref<1x8x128xf32, #tpu.memory_space<vmem>>, vector<1x8x128xf32>
      %27 = vector.shape_cast %26 : vector<1x8x128xf32> to vector<8x128xf32>
      %28 = vector.shape_cast %25 : vector<8x128xf32> to vector<1x8x128xf32>
      tpu.vector_store %arg9[%c0_16, %c0_17, %c0_18], %28 {strides = array<i32>} : memref<1x8x128xf32, #tpu.memory_space<vmem>>, vector<1x8x128xf32>,
    } else {
    }
    return
  }
  func.func @transform_0(%arg0: i32, %arg1: i32, %arg2: memref<3xi32, #tpu.memory_space<smem>>, %arg3: memref<3xi32, #tpu.memory_space<smem>>) -> (i32, i32) {
    %0 = arith.index_cast %arg0 : i32 to index
    %1 = memref.load %arg3[%0] : memref<3xi32, #tpu.memory_space<smem>>
    %2 = arith.index_cast %arg0 : i32 to index
    %3 = memref.load %arg2[%2] : memref<3xi32, #tpu.memory_space<smem>>
    %c1_i32 = arith.constant 1 : i32
    %4 = arith.subi %3, %c1_i32 : i32
    %5 = arith.minsi %arg1, %4 : i32
    %6 = arith.addi %1, %5 : i32
    %c0_i32 = arith.constant 0 : i32
    %c0_i32_0 = arith.constant 0 : i32
    return %c0_i32, %6 : i32, i32
  }
  func.func @transform_1(%arg0: i32, %arg1: i32, %arg2: memref<3xi32, #tpu.memory_space<smem>>, %arg3: memref<3xi32, #tpu.memory_space<smem>>) -> (i32, i32) {
    %0 = arith.index_cast %arg0 : i32 to index
    %1 = memref.load %arg3[%0] : memref<3xi32, #tpu.memory_space<smem>>
    %2 = arith.index_cast %arg0 : i32 to index
    %3 = memref.load %arg2[%2] : memref<3xi32, #tpu.memory_space<smem>>
    %c1_i32 = arith.constant 1 : i32
    %4 = arith.subi %3, %c1_i32 : i32
    %5 = arith.minsi %arg1, %4 : i32
    %6 = arith.addi %1, %5 : i32
    %c0_i32 = arith.constant 0 : i32
    %c0_i32_0 = arith.constant 0 : i32
    return %6, %c0_i32 : i32, i32
  }
  func.func @transform_2(%arg0: i32, %arg1: i32, %arg2: memref<3xi32, #tpu.memory_space<smem>>, %arg3: memref<3xi32, #tpu.memory_space<smem>>) -> (i32, i32, i32) {
    %c0_i32 = arith.constant 0 : i32
    %c0_i32_0 = arith.constant 0 : i32
    %c0_i32_1 = arith.constant 0 : i32
    return %arg0, %c0_i32, %c0_i32_0 : i32, i32, i32
  }
  func.func @transform_3(%arg0: i32, %arg1: i32, %arg2: memref<3xi32, #tpu.memory_space<smem>>, %arg3: memref<3xi32, #tpu.memory_space<smem>>) -> (i32, i32, i32) {
    %c0_i32 = arith.constant 0 : i32
    %c0_i32_0 = arith.constant 0 : i32
    %c0_i32_1 = arith.constant 0 : i32
    return %arg0, %c0_i32, %c0_i32_0 : i32, i32, i32
  }
  func.func @transform_4(%arg0: i32, %arg1: i32, %arg2: memref<3xi32, #tpu.memory_space<smem>>, %arg3: memref<3xi32, #tpu.memory_space<smem>>) -> (i32, i32, i32) {
    %c0_i32 = arith.constant 0 : i32
    %c0_i32_0 = arith.constant 0 : i32
    %c0_i32_1 = arith.constant 0 : i32
    return %arg0, %c0_i32, %c0_i32_0 : i32, i32, i32
  }
  func.func @transform_5(%arg0: i32, %arg1: i32, %arg2: memref<3xi32, #tpu.memory_space<smem>>, %arg3: memref<3xi32, #tpu.memory_space<smem>>) -> (i32, i32, i32) {
    %c0_i32 = arith.constant 0 : i32
    %c0_i32_0 = arith.constant 0 : i32
    %c0_i32_1 = arith.constant 0 : i32
    return %arg0, %c0_i32, %c0_i32_0 : i32, i32, i32
  }
}

</mosaic_0001>

<bundles_post_ra>
// kernel: tpu_custom_call.1
= control target key start
LH: loop header
LB: loop body
LE: loop exit
PB: predicated region body
PF: predicated region fallthrough
CT: control target
= control target key end

     0   :  { %s1384_s0 = inlined_call_operand.vmem [shape: s32[3], index: 0, kind: input, shape index: {}]   ;;  %s1385_s2 = inlined_call_operand.vmem [shape: s32[1,384], index: 2, kind: input, shape index: {}]   ;;  %s1386_s3 = inlined_call_operand.vmem [shape: bf16[384,32], index: 3, kind: input, shape index: {}]   ;;  %s1387_s4 = inlined_call_operand.vmem [shape: bf16[3,32,128], index: 4, kind: input, shape index: {}]   ;;  %s1388_s5 = inlined_call_operand.vmem [shape: f32[3,1,128], index: 5, kind: input, shape index: {}]   ;;  %s1389_s6 = inlined_call_operand.vmem [shape: bf16[3,128,128], index: 6, kind: input, shape index: {}]   ;;  %s1390_s7 = inlined_call_operand.hbm [shape: f32[3,8,128], index: 7, kind: output, shape index: {}]   ;;  %s1391_s1 = inlined_call_operand.vmem [shape: s32[3], index: 1, kind: input, shape index: {}]  }
   0x1   :  { %s12_s26 = sshll.u32 %s1384_s0, 4  ;;  %s16_s29 = sshll.u32 %s1391_s1, 4  ;;  %s13_s26 = int_to_ptr.vmem [resolvable:$true] %s12_s26  ;;  %s17_s29 = int_to_ptr.vmem [resolvable:$true] %s16_s29 }
   0x2   :  { %s1040_s30 = scalar_lea.vmem %s13_s26, 16  ;;  %p1045_p1 = scmp.lt.s32.totalorder %s13_s26, %s13_s26 }
   0x3   :  { %p1041_p0 = scmp.ne.s32.totalorder %s13_s26, %s1040_s30  ;;  %p1046_p2 = scmp.lt.s32.totalorder %s1040_s30, %s1040_s30 }
   0x5   :  { %p1047_p3 = por %p1046_p2, %p1045_p1 }
   0x7   :  { %p1048_p4 = pnand %p1047_p3, %p1041_p0 }
   0x9   :  { %1051 = shalt.err (!%p1048_p4)  }
   0xa   :  { %s1144_s8 = smov [#allocation4]   ;;  %s1052_s9 = scalar_lea.vmem %s17_s29, 16 }
   0xb   :  { %15 = dma.vmem_to_smem %s13_s26, 16, %s1144_s8, [#allocation3] }
   0xc   :  { %p1053_p5 = scmp.ne.s32.totalorder %s17_s29, %s1052_s9  ;;  %p1057_p6 = scmp.lt.s32.totalorder %s17_s29, %s17_s29 }
   0xd   :  { %p1058_p7 = scmp.lt.s32.totalorder %s1052_s9, %s1052_s9 }
   0xf   :  { %p1059_p8 = por %p1058_p7, %p1057_p6 }
  0x11   :  { %p1060_p9 = pnand %p1059_p8, %p1053_p5 }
  0x13   :  { %1063 = shalt.err (!%p1060_p9)  }
  0x14   :  { %s1145_s0 = smov [#allocation5]  }
  0x15   :  { %19 = dma.vmem_to_smem %s17_s29, 16, %s1145_s0, [#allocation3] }
  0x16   :  { %1114 = dma.done.wait [#allocation3], 32 }
  0x17   :  { %1115 = vsyncadd [#allocation3], 4294967264 }
  0x18   :  { %21 = sfence }
  0x19   :  { %22 = vsyncpa [#allocation7], 0 }
  0x1a   :  { %24 = vsyncpa [#allocation7 + $0x1], 0  ;;  %s1198_s1 = smov 0   ;;  %s1200_s10 = smov 0  }
  0x1b   :  { %s1202_s11 = smov 0   ;;  %s1204_s12 = smov 0  }
  0x1c   :  { %s1206_s13 = smov 0   ;;  %s1208_s14 = smov 0  }
  0x1d LB: > { %1398 = sst [smem:[#allocation10_spill]] %s1122_s1  ;;  %s835_s15 = sadd.s32 4294967295, %s1142_s14   ;;  %s1142_s14 = sphi %s1208_s14, %s30_s14   ;;  %s1138_s13 = sphi %s1206_s13, %s1412_s13   ;;  %s1134_s12 = sphi %s1204_s12, %s1411_s12   ;;  %s1130_s11 = sphi %s1202_s11, %s1410_s11   ;;  %s1126_s10 = sphi %s1200_s10, %s1414_s10   ;;  %s1122_s1 = sphi %s1198_s1, %s1413_s1  }
  0x1e   : > { %1399 = sst [smem:[#allocation11_spill]] %s1130_s11  ;;  %s836_s16 = sadd.s32 4294967294, %s1142_s14  }
  0x1f   : > { %1400 = sst [smem:[#allocation12_spill]] %s1138_s13  ;;  %s42_s17 = sadd.s32 1, %s1138_s13 }
  0x20   : > { %s203_s18 = sadd.s32 1, %s1130_s11  ;;  %p44_p10 = scmp.ge.s32.totalorder %s42_s17, 3 }
  0x21   : > { %p213_p11 = scmp.ne.s32.totalorder %s1130_s11, %s1126_s10  ;;  %p214_p12 = scmp.eq.s32.totalorder %s835_s15, 2 }
  0x22   : > { %p219_p13 = scmp.ne.s32.totalorder %s1126_s10, %s1122_s1  ;;  %s1416_s17 = smov (%p44_p10, %s42_s17), 0 }
  0x23   : > { %1401 = sst [smem:[#allocation13_spill]] %s1416_s17  ;;  %p1238_p0 = por %p214_p12, %p213_p11 }
  0x24   : > { %p220_p1 = scmp.eq.s32.totalorder %s836_s16, 2  ;;  %s200_s20 = ssub.s32 %s1138_s13, %s1416_s17 }
  0x25   : > { %p847_p2 = scmp.ge.s32.totalorder %s1142_s14, 1  ;;  %p201_p3 = scmp.eq.s32.totalorder %s200_s20, 0 }
  0x26   : > { %p1245_p4 = por %p220_p1, %p219_p13  ;;  %p299_p5 = scmp.lt.s32.totalorder %s1142_s14, 4 }
  0x27   : > { %s1251_s22 = scalar_select %p201_p3, %s1130_s11, %s203_s18  }
  0x28   : > { %s1403_s21 = scalar_select %p1245_p4, 1, 0 }
  0x29   : > { %1405 = sst [smem:[#allocation15_spill]] %s1251_s22  ;;  %p300_p6 = pnand %p847_p2, %p299_p5 }
  0x2a   : > { %1404 = sst [smem:[#allocation14_spill]] %s1403_s21  ;;  %p388_p7 = scmp.lt.s32.totalorder (!%p300_p6), %s1134_s12, 2 }
  0x2b   : > { %303 = sbr.rel (%p300_p6) target bundleno = 714 (0x2ca), region = 40  ;;  %s355_s23 = sld [smem:[#allocation5 + %s1134_s12]] (!%p300_p6) }
  0x2c   : > { %s356_s24 = sld [smem:[#allocation4 + %s1134_s12]] (!%p300_p6)  ;;  %s1392_s25 = sand.u32 (!%p300_p6), 1, %s1126_s10  }
  0x2d   : > { %s370_s26 = sld [smem:[#allocation5 + %s1134_s12]] (!%p300_p6)  ;;  %s848_s27 = sshll.u32 (!%p300_p6), %s1392_s25, 3 }
  0x2e   : > { %s371_s28 = sld [smem:[#allocation4 + %s1134_s12]] (!%p300_p6)  ;;  %s1266_s30 = scalar_lea.vmem (!%p300_p6), [#allocation6], %s848_s27 }
  0x2f   : > { %s409_s8 = sld [smem:[#allocation4 + %s1134_s12]] (!%p300_p6) }
  0x30   : > { %vm406_vm0 = vcmask 261120   ;;  %v1146_v0 = vmov 0.0   ;;  %s1264_s29 = scalar_select %p388_p7, %s1134_s12, 2 }
  0x31   : > { %407 = vst.msk [vmem:[#allocation2] sm:$0xff] %vm406_vm0, %v1146_v0  ;;  %408 = vst [vmem:[%s1266_s30] sm:$0xff] %v1146_v0 }
  0x32   : > { %s889_s9 = sshll.u32 %s1264_s29, 4  ;;  %s395_s16 = scalar_lea.vmem %s1388_s5, %s1264_s29 }
  0x33   : > { %s849_s18 = sadd.s32 4294967295, %s356_s24  ;;  %s1279_s17 = scalar_lea.vmem %s1387_s4, %s889_s9 }
  0x34   : > { %p850_p8 = scmp.gt.s32.totalorder %s849_s18, 0  ;;  %s890_s13 = sshll.u32 %s1264_s29, 6 }
  0x35   : > { %s851_s22 = sadd.s32 4294967295, %s371_s28  ;;  %s1285_s21 = scalar_lea.vmem %s1389_s6, %s890_s13 }
  0x36   : > { %s1418_s18 = smov (%p850_p8, %s849_s18), 0  ;;  %p852_p9 = scmp.gt.s32.totalorder %s851_s22, 0 }
  0x37   : > { %s360_s1 = sadd.s32 %s1418_s18, %s355_s23  ;;  %p860_p12 = scmp.le.s32.totalorder %s409_s8, 0 }
  0x38   : > { %p361_p10 = scmp.lt.s32.totalorder %s360_s1, 2  ;;  %s1420_s22 = smov (%p852_p9, %s851_s22), 0 }
  0x39   : > { %s375_s24 = sadd.s32 %s1420_s22, %s370_s26 }
  0x3a   : > { %s1422_s1 = smov (!%p361_p10, %s360_s1), 2  ;;  %s853_s15 = sshll.u32 %s375_s24, 4 }
  0x3b   : > { %s363_s0 = scalar_lea.vmem %s1385_s2, %s1422_s1  ;;  %p377_p11 = scmp.lt.s32.totalorder %s853_s15, 47 }
  0x3c   : > { %413 = sbr.rel (%p860_p12) target bundleno = 297 (0x129), region = 48 }
  0x3d   : > { %s1424_s15 = smov (!%p377_p11, %s853_s15), 47 }
  0x3e   : > { %s854_s28 = sshll.u32 %s1424_s15, 2 }
  0x3f   : > { %s380_s20 = scalar_lea.vmem %s1386_s3, %s854_s28 }
  0x41   : > { %v1022_v1 = vld [vmem:[%s380_s20 + $0x38] sm:$0xff]   ;;  %v1147_v2 = vmov 0.0   ;;  %v1023_v3 = vld [vmem:[%s380_s20 + $0x30] sm:$0xff]   ;;  %vm1148_vm1 = vmmov 0   ;;  %v1024_v4 = vld [vmem:[%s380_s20 + $0x28] sm:$0xff]   ;;  %v414_v8 = vlaneseq }
  0x42   : > { %912 = vmatprep.subr.bf16.mxu0 %v1147_v2  ;;  %928 = vmatprep.mubr.msk.bf16.mxu0 %vm1148_vm1, %v1147_v2  ;;  %v1025_v5 = vld [vmem:[%s380_s20 + $0x20] sm:$0xff]   ;;  %v1026_v6 = vld [vmem:[%s380_s20 + $0x18] sm:$0xff]   ;;  %v1027_v7 = vld [vmem:[%s380_s20 + $0x10] sm:$0xff]   ;;  %v1149_v13 = vmov 1.0|1.0  }
  0x43   : > { %913 = vmatpush3.bf16.msra.mxu0 %v1022_v1  ;;  %v1028_v9 = vld [vmem:[%s380_s20 + $0x8] sm:$0xff]   ;;  %v415_v10 = vshrl.u32 %v414_v8, 7  ;;  %v861_v11 = vld [vmem:[%s363_s0] ss:$0 sm:$0xff] }
  0x44   : > { %914 = vmatprep.subr.bf16.mxu0 %v1147_v2  ;;  %v1029_v12 = vld [vmem:[%s380_s20] sm:$0xff]  }
  0x45   : > { %vm421_vm2 = vcmp.eq.s32.totalorder %v861_v11, %v415_v10  ;;  %v425_v14 = vld [vmem:[#allocation2] sm:$0xff] }
  0x46   : > { %vm871_vm3 = vmpackc.low %vm421_vm2, %vm421_vm2 }
  0x47   : > { %915 = vmatpush3.bf16.msra.mxu0 %v1023_v3 }
  0x48   : > { %916 = vmatprep.subr.bf16.mxu0 %v1147_v2 }
  0x4b   : > { %917 = vmatpush3.bf16.msra.mxu0 %v1024_v4 }
  0x4c   : > { %918 = vmatprep.subr.bf16.mxu0 %v1147_v2 }
  0x4f   : > { %919 = vmatpush3.bf16.msra.mxu0 %v1025_v5 }
  0x50   : > { %920 = vmatprep.subr.bf16.mxu0 %v1147_v2 }
  0x53   : > { %921 = vmatpush3.bf16.msra.mxu0 %v1026_v6 }
  0x54   : > { %922 = vmatprep.subr.bf16.mxu0 %v1147_v2 }
  0x57   : > { %923 = vmatpush3.bf16.msra.mxu0 %v1027_v7 }
  0x58   : > { %924 = vmatprep.subr.bf16.mxu0 %v1147_v2 }
  0x5b   : > { %925 = vmatpush3.bf16.msra.mxu0 %v1028_v9 }
  0x5c   : > { %926 = vmatprep.subr.bf16.mxu0 %v1147_v2 }
  0x5f   : > { %927 = vmatpush3.bf16.msra.mxu0 %v1029_v12 }
  0x62   : > { %929 = vmatmul.mubr.msk.bf16.vlgmr.msra.gmra.mxu0 %vm871_vm3, %v1149_v13 }
 0x122   : > { %v524_v15 = vpop.f32.mrf.mxu0 }
 0x123   : > { %v530_v16 = vadd.f32 %v524_v15, %v425_v14 }
 0x124   : > { %v930_v17 = vpop.f32.mrf.mxu0 }
 0x125   : > { %532 = vst.msk [vmem:[#allocation2] sm:$0xff] %vm406_vm0, %v530_v16 }
 0x126   : > { %v527_v18 = vpop.f32.mrf.mxu0 }
 0x128   : > { %v931_v19 = vpop.f32.mrf.mxu0 }
 0x129 PF: > { %932 = vmatprep.subr.bf16.mxu0 %v1146_v0  ;;  %v1030_v20 = vld [vmem:[%s1279_s17 + $0x8] sm:$0xff]   ;;  %940 = vmatprep.subr.bf16.mxu1 %v1146_v0  ;;  %v1031_v21 = vld [vmem:[%s1279_s17] sm:$0xff]   ;;  %vm1150_vm4 = vmmov 0   ;;  %v1032_v23 = vld [vmem:[%s1285_s21 + $0x38] sm:$0xff]   ;;  %s886_s26 = sshll.u32 %s1134_s12, 7  ;;  %s726_s8 = sshll.u32 %s1266_s30, 4  ;;  %s1337_s8 = int_to_ptr.vmem [resolvable:$true] %s726_s8 }
 0x12a   : > { %936 = vmatprep.mubr.msk.bf16.mxu0 %vm1150_vm4, %v1146_v0  ;;  %956 = vmatprep.mubr.msk.bf16.mxu1 %vm1150_vm4, %v1146_v0  ;;  %v1033_v25 = vld [vmem:[%s1285_s21 + $0x30] sm:$0xff]   ;;  %v1034_v26 = vld [vmem:[%s1285_s21 + $0x28] sm:$0xff]   ;;  %v1035_v27 = vld [vmem:[%s1285_s21 + $0x20] sm:$0xff]   ;;  %s1335_s27 = scalar_lea.hbm %s1390_s7, %s886_s26  ;;  %s1406_s29 = sand.u32 1, %s1126_s10  }
 0x12b   : > { %933 = vmatpush3.bf16.msra.mxu0 %v1030_v20  ;;  %941 = vmatpush3.bf16.msra.mxu1 %v1032_v23  ;;  %v1036_v28 = vld [vmem:[%s1285_s21 + $0x18] sm:$0xff]   ;;  %v1037_v29 = vld [vmem:[%s1285_s21 + $0x10] sm:$0xff]   ;;  %v1038_v30 = vld [vmem:[%s1285_s21 + $0x8] sm:$0xff]   ;;  %s1064_s24 = scalar_lea.vmem %s1337_s8, 128  ;;  %s1151_s12 = smov [#allocation6]  }
 0x12c   : > { %v536_v22 = vld [vmem:[#allocation2] sm:$0xff]  ;;  %934 = vmatprep.subr.bf16.mxu0 %v1146_v0  ;;  %942 = vmatprep.subr.bf16.mxu1 %v1146_v0  ;;  %p1065_p13 = scmp.ne.s32.totalorder %s1337_s8, %s1064_s24  ;;  %s1068_s25 = sshll.u32 %s1151_s12, 4  ;;  %s1069_s25 = int_to_ptr.vmem [resolvable:$false] %s1068_s25 }
 0x12d   : > { %v537_v24 = vpack.c.bf16 %v536_v22, %v536_v22  ;;  %v1039_v31 = vld [vmem:[%s1285_s21] sm:$0xff]   ;;  %s1070_s9 = scalar_lea.vmem %s1069_s25, 256  ;;  %p1071_p3 = scmp.lt.s32.totalorder %s1337_s8, %s1069_s25 }
 0x12e   : > { %v873_v32 = vld [vmem:[%s395_s16] ss:$0 sm:$0xff]  ;;  %s713_s16 = scalar_lea.sflag [#allocation7], %s1406_s29  ;;  %p1066_p1 = pnand %p1065_p13, %p1238_p0 }
 0x12f   : > { %935 = vmatpush3.bf16.msra.mxu0 %v1031_v21  ;;  %943 = vmatpush3.bf16.msra.mxu1 %v1033_v25  ;;  %p1072_p5 = scmp.lt.s32.totalorder %s1070_s9, %s1064_s24 }
 0x130   : > { %944 = vmatprep.subr.bf16.mxu1 %v1146_v0  ;;  %p1067_p2 = pneg %p1066_p1 }
 0x131   : > { %p1073_p6 = por %p1072_p5, %p1071_p3 }
 0x132   : > { %937 = vmatmul.mubr.msk.bf16.vlgmr.msra.gmra.mxu0 %vm406_vm0, %v537_v24 }
 0x133   : > { %945 = vmatpush3.bf16.msra.mxu1 %v1034_v26  ;;  %p1074_p7 = pnand %p1073_p6, %p1067_p2 }
 0x134   : > { %946 = vmatprep.subr.bf16.mxu1 %v1146_v0 }
 0x137   : > { %947 = vmatpush3.bf16.msra.mxu1 %v1035_v27 }
 0x138   : > { %948 = vmatprep.subr.bf16.mxu1 %v1146_v0 }
 0x13b   : > { %949 = vmatpush3.bf16.msra.mxu1 %v1036_v28 }
 0x13c   : > { %950 = vmatprep.subr.bf16.mxu1 %v1146_v0 }
 0x13f   : > { %951 = vmatpush3.bf16.msra.mxu1 %v1037_v29 }
 0x140   : > { %952 = vmatprep.subr.bf16.mxu1 %v1146_v0 }
 0x143   : > { %953 = vmatpush3.bf16.msra.mxu1 %v1038_v30 }
 0x144   : > { %954 = vmatprep.subr.bf16.mxu1 %v1146_v0 }
 0x147   : > { %955 = vmatpush3.bf16.msra.mxu1 %v1039_v31 }
 0x1f2   : > { %v599_v33 = vpop.f32.mrf.mxu0 }
 0x1f3   : > { %v600_v34 = vadd.f32 %v873_v32, %v599_v33 }
 0x1f4   : > { %v938_v35 = vpop.f32.mrf.mxu0 }
 0x1f5   : > { %v605_v36 = vmax.f32 %v600_v34, 0.0 }
 0x1f6   : > { %v602_v37 = vpop.f32.mrf.mxu0 }
 0x1f7   : > { %v606_v38 = vpack.c.bf16 %v605_v36, %v605_v36 }
 0x1f8   : > { %v939_v39 = vpop.f32.mrf.mxu0 }
 0x1f9   : > { %957 = vmatmul.mubr.bf16.vlgmr.msra.gmra.mxu1 %v606_v38 }
 0x2b9   : > { %v705_v40 = vpop.f32.mrf.mxu1 }
 0x2ba   : > { %711 = vst [vmem:[%s1266_s30] sm:$0xff] %v705_v40 }
 0x2bb   : > { %v958_v41 = vpop.f32.mrf.mxu1 }
 0x2bc   : > { %1077 = shalt.err (!%p1074_p7)
}
 0x2bd   : > { %s1078_s30 = scalar_lea.hbm %s1335_s27, 128  ;;  %s1082_s28 = scalar_lea.hbm %s1390_s7, 384 }
 0x2be   : > { %p1079_p8 = scmp.ne.s32.totalorder %s1335_s27, %s1078_s30  ;;  %p1083_p11 = scmp.lt.s32.totalorder %s1335_s27, %s1390_s7 }
 0x2bf   : > { %p1084_p12 = scmp.lt.s32.totalorder %s1082_s28, %s1078_s30 }
 0x2c0   : > { %p1080_p9 = pnand %p1079_p8, %p1238_p0 }
 0x2c1   : > { %p1085_p13 = por %p1084_p12, %p1083_p11 }
 0x2c2   : > { %p1081_p10 = pneg %p1080_p9 }
 0x2c4   : > { %p1086_p1 = pnand %p1085_p13, %p1081_p10 }
 0x2c6   : > { %1089 = shalt.err (!%p1086_p1)
}
 0x2c7   : > { %960 = dma.vmem_to_hbm [thread:$0]  (%p1238_p0), %s1337_s8, 128, %s1335_s27, %s713_s16   ;;  %v708_v42 = vpop.f32.mrf.mxu1 }
 0x2c9   : > { %v959_v43 = vpop.f32.mrf.mxu1 }
 0x2ca PF: > { %s1407_s20 = sld [smem:[#allocation10_spill]]  ;;  %p966_p2 = scmp.ge.s32.totalorder %s1142_s14, 2 }
 0x2cc   : > { %p963_p3 = pnand %p966_p2, %p1245_p4 }
 0x2ce   : > { %p964_p5 = pneg %p963_p3 }
 0x2d0   : > { %s738_s23 = sand.u32 1, %s1407_s20  }
 0x2d1   : > { %s739_s1 = scalar_lea.sflag [#allocation7], %s738_s23 }
 0x2d2   : > { %1117 = dma.done.wait (%p964_p5), %s739_s1, 128  }
 0x2d3   : > { %1119 = vsyncadd (%p964_p5), %s739_s1, 4294967168  ;;  %s30_s14 = sadd.s32 1, %s1142_s14   ;;  %s1409_s19 = sld [smem:[#allocation11_spill]] }
 0x2d4   : > { %p27_p6 = scmp.ge.s32.totalorder %s30_s14, 5   ;;  %s1410_s11 = sld [smem:[#allocation15_spill]] }
 0x2d5   : > { %s1411_s12 = sld [smem:[#allocation12_spill]]  ;;  %s1413_s1 = smov %s1126_s10 }
 0x2d6   : > { %s1412_s13 = sld [smem:[#allocation13_spill]]  ;;  %29 = sbr.rel (!%p27_p6) target bundleno = 29 (0x1d), region = 99 }
 0x2d9   : > { %s1414_s10 = smov %s1409_s19 }
 0x2db   :  { %744 = vsyncpa [#allocation7], 1 }
 0x2dc   :  { %746 = vsyncpa [#allocation7 + $0x1], 1 }

</bundles_post_ra>
